<compile_context>
chip_gen: v7x
topology: tpu7x:2x2x1
jax: 0.10.0
libtpu: 0.0.40
codegen_flags: <defaults>
</compile_context>

<pallas_src>
import functools
import math

import jax
import jax.numpy as jnp
from jax.experimental import pallas as pl
from jax.experimental.pallas import tpu as pltpu

BN_EPS = 1e-5


def _round_up(a, b):
    return (a + b - 1) // b * b


# ----------------------------------------------------------------------------
# Streaming matmul kernel: weights resident in VMEM, 1-D grid over M.
# C = A @ W  (bf16 operands, f32 result via MXU f32 accumulation)
# ----------------------------------------------------------------------------
def _matmul_kernel(x_ref, w_ref, o_ref):
    o_ref[...] = jnp.dot(x_ref[...], w_ref[...],
                         preferred_element_type=jnp.float32).astype(o_ref.dtype)


def matmul_streaming(patches, wcat):
    """patches: (M, Kp) bf16 (Kp zero-padded, multiple of 128);
    wcat: (Kp, N) bf16.  Returns (M, N) f32.

    Weights are small enough to stay resident in VMEM (constant index_map),
    so this is a single streaming pass over the patch rows.
    """
    M, Kp = patches.shape
    Kw, N = wcat.shape
    assert Kp == Kw and Kp % 128 == 0
    # TODO(synk): for very large Cin (Kp beyond a few thousand) a K-tiled
    # accumulator variant would be needed; typical Cin fits resident.

    tm = min(512, _round_up(M, 16))           # bf16 sublane (16) aligned
    gm = pl.cdiv(M, tm)
    if gm > 1 and gm % 2 == 1:
        # Prefer an even tile count so v7x's two TensorCores split evenly.
        tm_even = _round_up(pl.cdiv(M, gm + 1), 16)
        if pl.cdiv(M, tm_even) % 2 == 0:
            tm = tm_even
            gm = pl.cdiv(M, tm)

    return pl.pallas_call(
        _matmul_kernel,
        out_shape=jax.ShapeDtypeStruct((M, N), jnp.float32),
        grid=(gm,),
        in_specs=[pl.BlockSpec((tm, Kp), lambda i: (i, 0)),   # streamed A tiles
                  pl.BlockSpec((Kp, N), lambda i: (0, 0))],   # resident weights
        out_specs=pl.BlockSpec((tm, N), lambda i: (i, 0)),
        compiler_params=pltpu.CompilerParams(
            dimension_semantics=("parallel",),
            vmem_limit_bytes=32 * 1024 * 1024),
        cost_estimate=pl.CostEstimate(
            flops=2 * M * N * Kp,
            transcendentals=0,
            bytes_accessed=M * Kp * 2 + Kp * N * 2 + M * N * 4),
    )(patches, wcat)


# ----------------------------------------------------------------------------
# im2col glue (plain JAX): single bf16 materialization, K pre-padded.
# ----------------------------------------------------------------------------
def im2col_3x3_bf16(x, stride, k_pad_to):
    """x: (B, H, W, C) -> (B*Ho*Wo, k_pad_to) bf16 patches, (ky, kx, c) order,
    with zero padding along K fused into the single concatenate."""
    B, H, W, C = x.shape
    Ho = (H - 1) // stride + 1
    Wo = (W - 1) // stride + 1
    xb = x.astype(jnp.bfloat16)
    xp = jnp.pad(xb, ((0, 0), (1, 1), (1, 1), (0, 0)))
    taps = []
    for dy in range(3):
        for dx in range(3):
            taps.append(xp[:, dy:dy + stride * (Ho - 1) + 1:stride,
                              dx:dx + stride * (Wo - 1) + 1:stride, :])
    kpad = k_pad_to - 9 * C
    if kpad:
        taps.append(jnp.zeros((B, Ho, Wo, kpad), jnp.bfloat16))
    # TODO(synk): a fully tap-streamed variant (patches assembled in VMEM via
    # per-tile offset DMAs) would avoid this one HBM materialization entirely.
    patches = jnp.concatenate(taps, axis=-1)
    return patches.reshape(B * Ho * Wo, k_pad_to), Ho, Wo


# ----------------------------------------------------------------------------
# FourierConvLayer forward
# ----------------------------------------------------------------------------
def fourier_conv_layer(x_nchw, params):
    """rfft2 -> complex 3x3 conv (Pallas matmul) -> irfft2 -> BatchNorm2d."""
    w_real = params['w_real']          # (3, 3, Cin, Cout)  HWIO
    w_imag = params['w_imag']
    bn_scale = params['bn_scale']      # (Cout,) effective affine scale (eval-mode BN)
    bn_bias = params['bn_bias']        # (Cout,) effective affine bias
    stride = params['stride']

    x = jnp.transpose(x_nchw, (0, 2, 3, 1)).astype(jnp.float32)   # NCHW -> NHWC
    B, H, W, Cin = x.shape
    Cout = w_real.shape[-1]

    # TODO(synk): rfft2/irfft2 have no Pallas TPU primitive; they stay in XLA.
    xf = jnp.fft.rfft2(x, axes=(1, 2))                  # (B, H, W//2+1, Cin)
    re = jnp.real(xf).astype(jnp.float32)
    im = jnp.imag(xf).astype(jnp.float32)

    # Fold the BatchNorm scale into the conv weights (exact: irfft2 is linear
    # per channel).  conv_real and conv_imag fused into one matmul over the
    # shared im2col patches of [re; im]; weights concatenated along N.
    K = 9 * Cin
    Kp = _round_up(K, 128)              # K must be zero-padded for correctness
    w_r = (w_real * bn_scale).reshape(K, Cout)
    w_i = (w_imag * bn_scale).reshape(K, Cout)
    wcat = jnp.concatenate([w_r, w_i], axis=1).astype(jnp.bfloat16)  # (K, 2*Cout)
    wcat = jnp.pad(wcat, ((0, Kp - K), (0, 0)))

    t = jnp.concatenate([re, im], axis=0)               # (2B, H, Wf, Cin)
    patches, Ho, Wo = im2col_3x3_bf16(t, stride, Kp)    # (2B*Ho*Wo, Kp) bf16

    y = matmul_streaming(patches, wcat).reshape(2 * B, Ho, Wo, 2 * Cout)
    cr, ci = y[..., :Cout], y[..., Cout:]               # conv_real(.), conv_imag(.)

    real_out = cr[:B] - ci[B:]                          # conv_real(re) - conv_imag(im)
    imag_out = cr[B:] + ci[:B]                          # conv_real(im) + conv_imag(re)

    out = jnp.fft.irfft2(real_out + 1j * imag_out,
                         s=(H // stride, W // stride), axes=(1, 2))
    # Remaining BatchNorm term: per-channel bias, a trivial broadcast add that
    # fuses with the NHWC->NCHW transpose in XLA (scale already folded above).
    out = out.astype(jnp.float32) + bn_bias[None, None, None, :]
    return jnp.transpose(out, (0, 3, 1, 2))             # NHWC -> NCHW


# ----------------------------------------------------------------------------
# Deterministic parameter construction (mirrors nn.Conv2d / nn.BatchNorm2d)
# ----------------------------------------------------------------------------
def make_params(key, in_channels, out_channels, stride=1):
    k1, k2 = jax.random.split(key)
    std = math.sqrt(2.0 / (out_channels * 9))
    w_real = (std * jax.random.normal(
        k1, (3, 3, in_channels, out_channels))).astype(jnp.float32)
    w_imag = (std * jax.random.normal(
        k2, (3, 3, in_channels, out_channels))).astype(jnp.float32)
    # Inference-mode BatchNorm2d: running_mean=0, running_var=1, gamma=1, beta=0.
    # TODO(synk): training-mode batch statistics are not implemented.
    bn_scale = jnp.full((out_channels,), 1.0 / math.sqrt(1.0 + BN_EPS), jnp.float32)
    bn_bias = jnp.zeros((out_channels,), jnp.float32)
    return {'w_real': w_real, 'w_imag': w_imag,
            'bn_scale': bn_scale, 'bn_bias': bn_bias, 'stride': stride}


if __name__ == "__main__":
    key = jax.random.PRNGKey(0)
    pkey, xkey = jax.random.split(key)

    B, Cin, H, W = 2, 4, 16, 16
    Cout, stride = 16, 1
    params = make_params(pkey, Cin, Cout, stride)
    x = jax.random.normal(xkey, (B, Cin, H, W), dtype=jnp.float32)

    fwd = jax.jit(functools.partial(fourier_conv_layer, params=params))
    out = jax.block_until_ready(fwd(x))
    assert out.shape == (B, Cout, H // stride, W // stride)
    assert out.dtype == jnp.float32
    print("KERNEL_OK")
</pallas_src>

<mosaic_0001>
module attributes {stable_mosaic.version = 11 : i64} {
  func.func @_matmul_kernel(%arg0: i32, %arg1: memref<512x128xbf16, #tpu.memory_space<vmem>>, %arg2: memref<128x32xbf16, #tpu.memory_space<vmem>>, %arg3: memref<512x32xf32, #tpu.memory_space<vmem>>) attributes {dimension_semantics = [#tpu.dimension_semantics<parallel>], iteration_bounds = array<i64: 2>, scalar_prefetch = 0 : i64, scratch_operands = 0 : i64, tpu.core_type = #tpu.core_type<tc>, window_params = [{transform_indices = @transform_0, window_bounds = array<i64: 512, 128>}, {pipeline_mode = #tpu.pipeline_mode<synchronous>, transform_indices = @transform_1, window_bounds = array<i64: 128, 32>}, {transform_indices = @transform_2, window_bounds = array<i64: 512, 32>}]} {
    %c0 = arith.constant 0 : index
    %c0_0 = arith.constant 0 : index
    %0 = vector.load %arg1[%c0, %c0_0] : memref<512x128xbf16, #tpu.memory_space<vmem>>, vector<512x128xbf16>
    %c0_1 = arith.constant 0 : index
    %c0_2 = arith.constant 0 : index
    %1 = vector.load %arg2[%c0_1, %c0_2] : memref<128x32xbf16, #tpu.memory_space<vmem>>, vector<128x32xbf16>
    %cst = arith.constant dense<0.000000e+00> : vector<512x32xf32>
    %2 = tpu.matmul %0, %1, %cst {dimension_numbers = #tpu.dot_dimension_numbers<[1], [0], [0], [1], [0, 0, 1, 1], [], []>} : vector<512x128xbf16>, vector<128x32xbf16>, vector<512x32xf32> -> vector<512x32xf32>
    %c0_3 = arith.constant 0 : index
    %c0_4 = arith.constant 0 : index
    %3 = vector.load %arg3[%c0_3, %c0_4] : memref<512x32xf32, #tpu.memory_space<vmem>>, vector<512x32xf32>
    tpu.vector_store %arg3[%c0_3, %c0_4], %2 {strides = array<i32>} : memref<512x32xf32, #tpu.memory_space<vmem>>, vector<512x32xf32>,
    return
  }
  func.func @transform_0(%arg0: i32) -> (i32, i32) {
    %c0_i32 = arith.constant 0 : i32
    %c0_i32_0 = arith.constant 0 : i32
    return %arg0, %c0_i32 : i32, i32
  }
  func.func @transform_1(%arg0: i32) -> (i32, i32) {
    %c0_i32 = arith.constant 0 : i32
    %c0_i32_0 = arith.constant 0 : i32
    %c0_i32_1 = arith.constant 0 : i32
    return %c0_i32, %c0_i32_0 : i32, i32
  }
  func.func @transform_2(%arg0: i32) -> (i32, i32) {
    %c0_i32 = arith.constant 0 : i32
    %c0_i32_0 = arith.constant 0 : i32
    return %arg0, %c0_i32 : i32, i32
  }
}

</mosaic_0001>

<bundles_post_ra>
// kernel: fourier_conv_layer.1
= control target key start
LH: loop header
LB: loop body
LE: loop exit
PB: predicated region body
PF: predicated region fallthrough
CT: control target
= control target key end

     0   :  { %s1741_s9 = smov 0   ;;  %s1743_s10 = smov 0   ;;  %s2173_s0 = inlined_call_operand.vmem [shape: bf16[576,128], index: 0, kind: input, shape index: {}]   ;;  %s2174_s1 = inlined_call_operand.vmem [shape: bf16[128,32], index: 1, kind: input, shape index: {}]   ;;  %s2175_s2 = inlined_call_operand.vmem [shape: f32[576,32], index: 2, kind: output, shape index: {}]  }
   0x1   :  { %s1745_s11 = smov 0  }
   0x2 LB: > { %s1754_s12 = sadd.s32 4294967295, %s1692_s11   ;;  %s1756_s13 = sadd.s32 1, %s1692_s11   ;;  %s1692_s11 = sphi %s1745_s11, %s2184_s11   ;;  %s1688_s10 = sphi %s1743_s10, %s2183_s10   ;;  %s1684_s9 = sphi %s1741_s9, %s2182_s9  }
   0x3   : > { %s63_s14 = ssub.s32 %s1692_s11, %s1756_s13  ;;  %s66_s15 = sadd.s32 1, %s1688_s10 }
   0x4   : > { %p64_p0 = scmp.eq.s32.totalorder %s63_s14, 0  ;;  %p76_p1 = scmp.ne.s32.totalorder %s1688_s10, %s1684_s9 }
   0x5   : > { %p77_p2 = scmp.eq.s32.totalorder %s1754_s12, 1  ;;  %p1310_p3 = scmp.ge.s32.totalorder %s1692_s11, 1 }
   0x6   : > { %s1764_s16 = scalar_select %p64_p0, %s1688_s10, %s66_s15  }
   0x7   : > { %p1766_p4 = por %p77_p2, %p76_p1  ;;  %p121_p5 = scmp.lt.s32.totalorder %s1692_s11, 3 }
   0x9   : > { %p122_p6 = pnand %p1310_p3, %p121_p5 }
   0xa   : > { %v1598_v0 = vld [vmem:[%s2174_s1] sm:$0xff] (!%p122_p6)   ;;  %s1774_s20 = sshll.u32 (!%p122_p6), %s1754_s12, 6  ;;  %v1599_v1 = vld [vmem:[%s2174_s1 + $0x8] sm:$0xff] (!%p122_p6)   ;;  %v1600_v2 = vld [vmem:[%s2174_s1 + $0x10] sm:$0xff] (!%p122_p6)   ;;  %s143_s18 = sand.u32 (!%p122_p6), 1, %s1684_s9   ;;  %vm775_vm0 = vcmask (!%p122_p6), 261120  }
   0xb   : > { %125 = sbr.rel (%p122_p6) target bundleno = 388 (0x184), region = 28  ;;  %p151_p7 = scmp.lt.s32.totalorder (!%p122_p6), %s1774_s20, 71  ;;  %1414 = vmatprep.subr.bf16.mxu0 (!%p122_p6), %v1598_v0  ;;  %1494 = vmatprep.subr.bf16.mxu1 (!%p122_p6), %v1598_v0  ;;  %v1601_v3 = vld [vmem:[%s2174_s1 + $0x18] sm:$0xff] (!%p122_p6)   ;;  %v1602_v6 = vld [vmem:[%s2174_s1 + $0x20] sm:$0xff] (!%p122_p6)   ;;  %v1603_v7 = vld [vmem:[%s2174_s1 + $0x28] sm:$0xff] (!%p122_p6)  }
   0xc   : > { %1415 = vmatpush3.bf16.msra.mxu0 (!%p122_p6), %v1598_v0  ;;  %1502 = vmatpush3.bf16.msra.mxu1 (!%p122_p6), %v1598_v0  ;;  %v1604_v8 = vld [vmem:[%s2174_s1 + $0x30] sm:$0xff] (!%p122_p6)   ;;  %v1605_v9 = vld [vmem:[%s2174_s1 + $0x38] sm:$0xff] (!%p122_p6)   ;;  %s1311_s19 = sshll.u32 (!%p122_p6), %s143_s18, 9 }
   0xd   : > { %1416 = vmatprep.subr.bf16.mxu0 (!%p122_p6), %v1599_v1  ;;  %1495 = vmatprep.subr.bf16.mxu1 (!%p122_p6), %v1599_v1  ;;  %s1837_s21 = scalar_lea.vmem (!%p122_p6), [#allocation2], %s1311_s19  }
  0x10   : > { %1417 = vmatpush3.bf16.msra.mxu0 (!%p122_p6), %v1599_v1  ;;  %1503 = vmatpush3.bf16.msra.mxu1 (!%p122_p6), %v1599_v1 }
  0x11   : > { %1418 = vmatprep.subr.bf16.mxu0 (!%p122_p6), %v1600_v2  ;;  %1496 = vmatprep.subr.bf16.mxu1 (!%p122_p6), %v1600_v2 }
  0x12   : > { %s152_s23 = scalar_select %p151_p7, %s1774_s20, 71 }
  0x13   : > { %s848_s9 = ssub.s32 (%p1766_p4), 72, %s1774_s20  ;;  %s1371_s22 = sshll.u32 (%p1766_p4), %s1754_s12, 9 }
  0x14   : > { %s1313_s26 = sshll.u32 %s152_s23, 2  ;;  %1419 = vmatpush3.bf16.msra.mxu0 %v1600_v2  ;;  %1504 = vmatpush3.bf16.msra.mxu1 %v1600_v2  ;;  %p849_p8 = scmp.lt.s32.totalorder (%p1766_p4), %s848_s9, 64 }
  0x15   : > { %s1787_s29 = scalar_lea.vmem %s2173_s0, %s1313_s26  ;;  %1420 = vmatprep.subr.bf16.mxu0 %v1601_v3  ;;  %1497 = vmatprep.subr.bf16.mxu1 %v1601_v3  ;;  %s1974_s25 = scalar_lea.vmem (%p1766_p4), %s2175_s2, %s1371_s22  }
  0x16   : > { %v1606_v4 = vld [vmem:[%s1787_s29] sm:$0xff]   ;;  %v1608_v10 = vld [vmem:[%s1787_s29 + $0x8] sm:$0xff]   ;;  %v1610_v12 = vld [vmem:[%s1787_s29 + $0x10] sm:$0xff]  }
  0x17   : > { %v1607_v5 = vld [vmem:[%s1787_s29 + $0x80] sm:$0xff]   ;;  %1430 = vmatprep.mubr.bf16.mxu0 %v1606_v4  ;;  %v1609_v11 = vld [vmem:[%s1787_s29 + $0x88] sm:$0xff]   ;;  %v1611_v13 = vld [vmem:[%s1787_s29 + $0x90] sm:$0xff]  }
  0x18   : > { %1462 = vmatprep.mubr.bf16.mxu1 %v1607_v5  ;;  %1421 = vmatpush3.bf16.msra.mxu0 %v1601_v3  ;;  %v1612_v14 = vld [vmem:[%s1787_s29 + $0x18] sm:$0xff]   ;;  %v1614_v16 = vld [vmem:[%s1787_s29 + $0x20] sm:$0xff]   ;;  %v1616_v18 = vld [vmem:[%s1787_s29 + $0x28] sm:$0xff]  }
  0x19   : > { %1505 = vmatpush3.bf16.msra.mxu1 %v1601_v3  ;;  %1422 = vmatprep.subr.bf16.mxu0 %v1602_v6  ;;  %v1613_v15 = vld [vmem:[%s1787_s29 + $0x98] sm:$0xff]   ;;  %v1615_v17 = vld [vmem:[%s1787_s29 + $0xa0] sm:$0xff]   ;;  %v1617_v19 = vld [vmem:[%s1787_s29 + $0xa8] sm:$0xff]  }
  0x1a   : > { %1498 = vmatprep.subr.bf16.mxu1 %v1602_v6  ;;  %v1618_v20 = vld [vmem:[%s1787_s29 + $0x30] sm:$0xff]   ;;  %v1620_v22 = vld [vmem:[%s1787_s29 + $0x38] sm:$0xff]   ;;  %v1622_v24 = vld [vmem:[%s1787_s29 + $0x40] sm:$0xff]  }
  0x1b   : > { %v1619_v21 = vld [vmem:[%s1787_s29 + $0xb0] sm:$0xff]   ;;  %v1621_v23 = vld [vmem:[%s1787_s29 + $0xb8] sm:$0xff]   ;;  %v1623_v25 = vld [vmem:[%s1787_s29 + $0xc0] sm:$0xff]  }
  0x1c   : > { %1423 = vmatpush3.bf16.msra.mxu0 %v1602_v6  ;;  %v1624_v26 = vld [vmem:[%s1787_s29 + $0x48] sm:$0xff]   ;;  %v1626_v28 = vld [vmem:[%s1787_s29 + $0x50] sm:$0xff]   ;;  %v1628_v30 = vld [vmem:[%s1787_s29 + $0x58] sm:$0xff]  }
  0x1d   : > { %1506 = vmatpush3.bf16.msra.mxu1 %v1602_v6  ;;  %1424 = vmatprep.subr.bf16.mxu0 %v1603_v7  ;;  %v1625_v27 = vld [vmem:[%s1787_s29 + $0xc8] sm:$0xff]   ;;  %v1627_v29 = vld [vmem:[%s1787_s29 + $0xd0] sm:$0xff]   ;;  %v1629_v31 = vld [vmem:[%s1787_s29 + $0xd8] sm:$0xff]  }
  0x1e   : > { %1499 = vmatprep.subr.bf16.mxu1 %v1603_v7  ;;  %v1630_v32 = vld [vmem:[%s1787_s29 + $0x60] sm:$0xff]   ;;  %v1632_v34 = vld [vmem:[%s1787_s29 + $0x68] sm:$0xff]   ;;  %v1634_v36 = vld [vmem:[%s1787_s29 + $0x70] sm:$0xff]  }
  0x1f   : > { %v1631_v33 = vld [vmem:[%s1787_s29 + $0xe0] sm:$0xff]   ;;  %v1633_v35 = vld [vmem:[%s1787_s29 + $0xe8] sm:$0xff]   ;;  %v1635_v37 = vld [vmem:[%s1787_s29 + $0xf0] sm:$0xff]  }
  0x20   : > { %1425 = vmatpush3.bf16.msra.mxu0 %v1603_v7  ;;  %v1636_v38 = vld [vmem:[%s1787_s29 + $0x78] sm:$0xff]  }
  0x21   : > { %1507 = vmatpush3.bf16.msra.mxu1 %v1603_v7  ;;  %1426 = vmatprep.subr.bf16.mxu0 %v1604_v8  ;;  %v1637_v39 = vld [vmem:[%s1787_s29 + $0xf8] sm:$0xff]  }
  0x22   : > { %1500 = vmatprep.subr.bf16.mxu1 %v1604_v8 }
  0x24   : > { %1427 = vmatpush3.bf16.msra.mxu0 %v1604_v8 }
  0x25   : > { %1508 = vmatpush3.bf16.msra.mxu1 %v1604_v8  ;;  %1428 = vmatprep.subr.bf16.mxu0 %v1605_v9 }
  0x26   : > { %1501 = vmatprep.subr.bf16.mxu1 %v1605_v9 }
  0x28   : > { %1429 = vmatpush3.bf16.msra.mxu0 %v1605_v9 }
  0x29   : > { %1509 = vmatpush3.bf16.msra.mxu1 %v1605_v9 }
  0x2b   : > { %1431 = vmatmul.mubr.bf16.vlgmr.msra.gmra.mrb[0].mxu0 %v1608_v10 }
  0x2c   : > { %1463 = vmatmul.mubr.bf16.vlgmr.msra.gmra.mrb[0].mxu1 %v1609_v11  ;;  %1434 = vmatprep.mubr.bf16.mxu0 %v1610_v12 }
  0x2d   : > { %1466 = vmatprep.mubr.bf16.mxu1 %v1611_v13 }
  0x33   : > { %1435 = vmatmul.mubr.bf16.gmra.mrb[4].mxu0 %v1612_v14 }
  0x34   : > { %1467 = vmatmul.mubr.bf16.gmra.mrb[4].mxu1 %v1613_v15  ;;  %1438 = vmatprep.mubr.bf16.mxu0 %v1614_v16 }
  0x35   : > { %1470 = vmatprep.mubr.bf16.mxu1 %v1615_v17 }
  0x3b   : > { %1439 = vmatmul.mubr.bf16.gmra.mrb[8].mxu0 %v1616_v18 }
  0x3c   : > { %1471 = vmatmul.mubr.bf16.gmra.mrb[8].mxu1 %v1617_v19  ;;  %1442 = vmatprep.mubr.bf16.mxu0 %v1618_v20 }
  0x3d   : > { %1474 = vmatprep.mubr.bf16.mxu1 %v1619_v21 }
  0x43   : > { %1443 = vmatmul.mubr.bf16.gmra.mrb[12].mxu0 %v1620_v22 }
  0x44   : > { %1475 = vmatmul.mubr.bf16.gmra.mrb[12].mxu1 %v1621_v23  ;;  %1446 = vmatprep.mubr.bf16.mxu0 %v1622_v24 }
  0x45   : > { %1478 = vmatprep.mubr.bf16.mxu1 %v1623_v25 }
  0x4b   : > { %1447 = vmatmul.mubr.bf16.gmra.mrb[16].mxu0 %v1624_v26 }
  0x4c   : > { %1479 = vmatmul.mubr.bf16.gmra.mrb[16].mxu1 %v1625_v27  ;;  %1450 = vmatprep.mubr.bf16.mxu0 %v1626_v28 }
  0x4d   : > { %1482 = vmatprep.mubr.bf16.mxu1 %v1627_v29 }
  0x53   : > { %1451 = vmatmul.mubr.bf16.gmra.mrb[20].mxu0 %v1628_v30 }
  0x54   : > { %1483 = vmatmul.mubr.bf16.gmra.mrb[20].mxu1 %v1629_v31  ;;  %1454 = vmatprep.mubr.bf16.mxu0 %v1630_v32 }
  0x55   : > { %1486 = vmatprep.mubr.bf16.mxu1 %v1631_v33 }
  0x5b   : > { %1455 = vmatmul.mubr.bf16.gmra.mrb[24].mxu0 %v1632_v34 }
  0x5c   : > { %1487 = vmatmul.mubr.bf16.gmra.mrb[24].mxu1 %v1633_v35  ;;  %1458 = vmatprep.mubr.bf16.mxu0 %v1634_v36 }
  0x5d   : > { %1490 = vmatprep.mubr.bf16.mxu1 %v1635_v37 }
  0x63   : > { %1459 = vmatmul.mubr.bf16.gmra.mrb[28].mxu0 %v1636_v38 }
  0x64   : > { %1491 = vmatmul.mubr.bf16.gmra.mrb[28].mxu1 %v1637_v39 }
  0xfe   : > { %v1432_v40 = vpop.f32.mrb[0].mxu0 }
  0xff   : > { %v1464_v41 = vpop.f32.mrb[0].mxu1  ;;  %778 = vst.msk [vmem:[%s1837_s21 + $0x10] sm:$0xff] %vm775_vm0, %v1432_v40  ;;  %v520_v42 = vpop.f32.mrb[1].mxu0 }
 0x100   : > { %810 = vst.msk [vmem:[%s1837_s21 + $0x110] sm:$0xff] %vm775_vm0, %v1464_v41  ;;  %v648_v43 = vpop.f32.mrb[1].mxu1  ;;  %776 = vst.msk [vmem:[%s1837_s21] sm:$0xff] %vm775_vm0, %v520_v42  ;;  %v1433_v44 = vpop.f32.mrb[2].mxu0 }
 0x101   : > { %808 = vst.msk [vmem:[%s1837_s21 + $0x100] sm:$0xff] %vm775_vm0, %v648_v43  ;;  %v1465_v45 = vpop.f32.mrb[2].mxu1  ;;  %779 = vst.msk [vmem:[%s1837_s21 + $0x18] sm:$0xff] %vm775_vm0, %v1433_v44  ;;  %v523_v46 = vpop.f32.mrb[3].mxu0 }
 0x102   : > { %811 = vst.msk [vmem:[%s1837_s21 + $0x118] sm:$0xff] %vm775_vm0, %v1465_v45  ;;  %v651_v47 = vpop.f32.mrb[3].mxu1  ;;  %777 = vst.msk [vmem:[%s1837_s21 + $0x8] sm:$0xff] %vm775_vm0, %v523_v46 }
 0x103   : > { %809 = vst.msk [vmem:[%s1837_s21 + $0x108] sm:$0xff] %vm775_vm0, %v651_v47 }
 0x106   : > { %v1436_v48 = vpop.f32.mrb[4].mxu0 }
 0x107   : > { %v1468_v49 = vpop.f32.mrb[4].mxu1  ;;  %782 = vst.msk [vmem:[%s1837_s21 + $0x30] sm:$0xff] %vm775_vm0, %v1436_v48  ;;  %v536_v50 = vpop.f32.mrb[5].mxu0 }
 0x108   : > { %814 = vst.msk [vmem:[%s1837_s21 + $0x130] sm:$0xff] %vm775_vm0, %v1468_v49  ;;  %v664_v51 = vpop.f32.mrb[5].mxu1  ;;  %780 = vst.msk [vmem:[%s1837_s21 + $0x20] sm:$0xff] %vm775_vm0, %v536_v50  ;;  %v1437_v52 = vpop.f32.mrb[6].mxu0 }
 0x109   : > { %812 = vst.msk [vmem:[%s1837_s21 + $0x120] sm:$0xff] %vm775_vm0, %v664_v51  ;;  %v1469_v53 = vpop.f32.mrb[6].mxu1  ;;  %783 = vst.msk [vmem:[%s1837_s21 + $0x38] sm:$0xff] %vm775_vm0, %v1437_v52  ;;  %v539_v54 = vpop.f32.mrb[7].mxu0 }
 0x10a   : > { %815 = vst.msk [vmem:[%s1837_s21 + $0x138] sm:$0xff] %vm775_vm0, %v1469_v53  ;;  %v667_v55 = vpop.f32.mrb[7].mxu1  ;;  %781 = vst.msk [vmem:[%s1837_s21 + $0x28] sm:$0xff] %vm775_vm0, %v539_v54 }
 0x10b   : > { %813 = vst.msk [vmem:[%s1837_s21 + $0x128] sm:$0xff] %vm775_vm0, %v667_v55 }
 0x10e   : > { %v1440_v56 = vpop.f32.mrb[8].mxu0 }
 0x10f   : > { %v1472_v57 = vpop.f32.mrb[8].mxu1  ;;  %786 = vst.msk [vmem:[%s1837_s21 + $0x50] sm:$0xff] %vm775_vm0, %v1440_v56  ;;  %v552_v58 = vpop.f32.mrb[9].mxu0 }
 0x110   : > { %818 = vst.msk [vmem:[%s1837_s21 + $0x150] sm:$0xff] %vm775_vm0, %v1472_v57  ;;  %v680_v59 = vpop.f32.mrb[9].mxu1  ;;  %784 = vst.msk [vmem:[%s1837_s21 + $0x40] sm:$0xff] %vm775_vm0, %v552_v58  ;;  %v1441_v60 = vpop.f32.mrb[10].mxu0 }
 0x111   : > { %816 = vst.msk [vmem:[%s1837_s21 + $0x140] sm:$0xff] %vm775_vm0, %v680_v59  ;;  %v1473_v61 = vpop.f32.mrb[10].mxu1  ;;  %787 = vst.msk [vmem:[%s1837_s21 + $0x58] sm:$0xff] %vm775_vm0, %v1441_v60  ;;  %v555_v62 = vpop.f32.mrb[11].mxu0 }
 0x112   : > { %819 = vst.msk [vmem:[%s1837_s21 + $0x158] sm:$0xff] %vm775_vm0, %v1473_v61  ;;  %v683_v63 = vpop.f32.mrb[11].mxu1  ;;  %785 = vst.msk [vmem:[%s1837_s21 + $0x48] sm:$0xff] %vm775_vm0, %v555_v62 }
 0x113   : > { %817 = vst.msk [vmem:[%s1837_s21 + $0x148] sm:$0xff] %vm775_vm0, %v683_v63 }
 0x116   : > { %v1444_v0 = vpop.f32.mrb[12].mxu0 }
 0x117   : > { %v1476_v1 = vpop.f32.mrb[12].mxu1  ;;  %790 = vst.msk [vmem:[%s1837_s21 + $0x70] sm:$0xff] %vm775_vm0, %v1444_v0  ;;  %v568_v2 = vpop.f32.mrb[13].mxu0 }
 0x118   : > { %822 = vst.msk [vmem:[%s1837_s21 + $0x170] sm:$0xff] %vm775_vm0, %v1476_v1  ;;  %v696_v3 = vpop.f32.mrb[13].mxu1  ;;  %788 = vst.msk [vmem:[%s1837_s21 + $0x60] sm:$0xff] %vm775_vm0, %v568_v2  ;;  %v1445_v4 = vpop.f32.mrb[14].mxu0 }
 0x119   : > { %820 = vst.msk [vmem:[%s1837_s21 + $0x160] sm:$0xff] %vm775_vm0, %v696_v3  ;;  %v1477_v5 = vpop.f32.mrb[14].mxu1  ;;  %791 = vst.msk [vmem:[%s1837_s21 + $0x78] sm:$0xff] %vm775_vm0, %v1445_v4  ;;  %v571_v6 = vpop.f32.mrb[15].mxu0 }
 0x11a   : > { %823 = vst.msk [vmem:[%s1837_s21 + $0x178] sm:$0xff] %vm775_vm0, %v1477_v5  ;;  %v699_v7 = vpop.f32.mrb[15].mxu1  ;;  %789 = vst.msk [vmem:[%s1837_s21 + $0x68] sm:$0xff] %vm775_vm0, %v571_v6 }
 0x11b   : > { %821 = vst.msk [vmem:[%s1837_s21 + $0x168] sm:$0xff] %vm775_vm0, %v699_v7 }
 0x11e   : > { %v1448_v8 = vpop.f32.mrb[16].mxu0 }
 0x11f   : > { %v1480_v9 = vpop.f32.mrb[16].mxu1  ;;  %794 = vst.msk [vmem:[%s1837_s21 + $0x90] sm:$0xff] %vm775_vm0, %v1448_v8  ;;  %v584_v10 = vpop.f32.mrb[17].mxu0 }
 0x120   : > { %826 = vst.msk [vmem:[%s1837_s21 + $0x190] sm:$0xff] %vm775_vm0, %v1480_v9  ;;  %v712_v11 = vpop.f32.mrb[17].mxu1  ;;  %792 = vst.msk [vmem:[%s1837_s21 + $0x80] sm:$0xff] %vm775_vm0, %v584_v10  ;;  %v1449_v12 = vpop.f32.mrb[18].mxu0 }
 0x121   : > { %824 = vst.msk [vmem:[%s1837_s21 + $0x180] sm:$0xff] %vm775_vm0, %v712_v11  ;;  %v1481_v13 = vpop.f32.mrb[18].mxu1  ;;  %795 = vst.msk [vmem:[%s1837_s21 + $0x98] sm:$0xff] %vm775_vm0, %v1449_v12  ;;  %v587_v14 = vpop.f32.mrb[19].mxu0 }
 0x122   : > { %827 = vst.msk [vmem:[%s1837_s21 + $0x198] sm:$0xff] %vm775_vm0, %v1481_v13  ;;  %v715_v15 = vpop.f32.mrb[19].mxu1  ;;  %793 = vst.msk [vmem:[%s1837_s21 + $0x88] sm:$0xff] %vm775_vm0, %v587_v14 }
 0x123   : > { %825 = vst.msk [vmem:[%s1837_s21 + $0x188] sm:$0xff] %vm775_vm0, %v715_v15 }
 0x126   : > { %v1452_v16 = vpop.f32.mrb[20].mxu0 }
 0x127   : > { %v1484_v17 = vpop.f32.mrb[20].mxu1  ;;  %798 = vst.msk [vmem:[%s1837_s21 + $0xb0] sm:$0xff] %vm775_vm0, %v1452_v16  ;;  %v600_v18 = vpop.f32.mrb[21].mxu0 }
 0x128   : > { %830 = vst.msk [vmem:[%s1837_s21 + $0x1b0] sm:$0xff] %vm775_vm0, %v1484_v17  ;;  %v728_v19 = vpop.f32.mrb[21].mxu1  ;;  %796 = vst.msk [vmem:[%s1837_s21 + $0xa0] sm:$0xff] %vm775_vm0, %v600_v18  ;;  %v1453_v20 = vpop.f32.mrb[22].mxu0 }
 0x129   : > { %828 = vst.msk [vmem:[%s1837_s21 + $0x1a0] sm:$0xff] %vm775_vm0, %v728_v19  ;;  %v1485_v21 = vpop.f32.mrb[22].mxu1  ;;  %799 = vst.msk [vmem:[%s1837_s21 + $0xb8] sm:$0xff] %vm775_vm0, %v1453_v20  ;;  %v603_v22 = vpop.f32.mrb[23].mxu0 }
 0x12a   : > { %831 = vst.msk [vmem:[%s1837_s21 + $0x1b8] sm:$0xff] %vm775_vm0, %v1485_v21  ;;  %v731_v23 = vpop.f32.mrb[23].mxu1  ;;  %797 = vst.msk [vmem:[%s1837_s21 + $0xa8] sm:$0xff] %vm775_vm0, %v603_v22 }
 0x12b   : > { %829 = vst.msk [vmem:[%s1837_s21 + $0x1a8] sm:$0xff] %vm775_vm0, %v731_v23 }
 0x12e   : > { %v1456_v24 = vpop.f32.mrb[24].mxu0 }
 0x12f   : > { %v1488_v25 = vpop.f32.mrb[24].mxu1  ;;  %802 = vst.msk [vmem:[%s1837_s21 + $0xd0] sm:$0xff] %vm775_vm0, %v1456_v24  ;;  %v616_v26 = vpop.f32.mrb[25].mxu0 }
 0x130   : > { %834 = vst.msk [vmem:[%s1837_s21 + $0x1d0] sm:$0xff] %vm775_vm0, %v1488_v25  ;;  %v744_v27 = vpop.f32.mrb[25].mxu1  ;;  %800 = vst.msk [vmem:[%s1837_s21 + $0xc0] sm:$0xff] %vm775_vm0, %v616_v26  ;;  %v1457_v28 = vpop.f32.mrb[26].mxu0 }
 0x131   : > { %832 = vst.msk [vmem:[%s1837_s21 + $0x1c0] sm:$0xff] %vm775_vm0, %v744_v27  ;;  %v1489_v29 = vpop.f32.mrb[26].mxu1  ;;  %803 = vst.msk [vmem:[%s1837_s21 + $0xd8] sm:$0xff] %vm775_vm0, %v1457_v28  ;;  %v619_v30 = vpop.f32.mrb[27].mxu0 }
 0x132   : > { %835 = vst.msk [vmem:[%s1837_s21 + $0x1d8] sm:$0xff] %vm775_vm0, %v1489_v29  ;;  %v747_v31 = vpop.f32.mrb[27].mxu1  ;;  %801 = vst.msk [vmem:[%s1837_s21 + $0xc8] sm:$0xff] %vm775_vm0, %v619_v30 }
 0x133   : > { %833 = vst.msk [vmem:[%s1837_s21 + $0x1c8] sm:$0xff] %vm775_vm0, %v747_v31 }
 0x135   : > { %846 = sbr.rel (!%p1766_p4) target bundleno = 388 (0x184), region = 32 }
 0x136   : > { %v1460_v32 = vpop.f32.mrb[28].mxu0 }
 0x137   : > { %v1492_v33 = vpop.f32.mrb[28].mxu1  ;;  %806 = vst.msk [vmem:[%s1837_s21 + $0xf0] sm:$0xff] %vm775_vm0, %v1460_v32  ;;  %v632_v34 = vpop.f32.mrb[29].mxu0 }
 0x138   : > { %838 = vst.msk [vmem:[%s1837_s21 + $0x1f0] sm:$0xff] %vm775_vm0, %v1492_v33  ;;  %v760_v35 = vpop.f32.mrb[29].mxu1  ;;  %804 = vst.msk [vmem:[%s1837_s21 + $0xe0] sm:$0xff] %vm775_vm0, %v632_v34  ;;  %v1461_v36 = vpop.f32.mrb[30].mxu0 }
 0x139   : > { %836 = vst.msk [vmem:[%s1837_s21 + $0x1e0] sm:$0xff] %vm775_vm0, %v760_v35  ;;  %v1493_v37 = vpop.f32.mrb[30].mxu1  ;;  %807 = vst.msk [vmem:[%s1837_s21 + $0xf8] sm:$0xff] %vm775_vm0, %v1461_v36  ;;  %v635_v38 = vpop.f32.mrb[31].mxu0 }
 0x13a   : > { %839 = vst.msk [vmem:[%s1837_s21 + $0x1f8] sm:$0xff] %vm775_vm0, %v1493_v37  ;;  %v763_v39 = vpop.f32.mrb[31].mxu1  ;;  %805 = vst.msk [vmem:[%s1837_s21 + $0xe8] sm:$0xff] %vm775_vm0, %v635_v38 }
 0x13b   : > { %837 = vst.msk [vmem:[%s1837_s21 + $0x1e8] sm:$0xff] %vm775_vm0, %v763_v39 }
 0x13c   : > { %s2186_s9 = smov (!%p849_p8, %s848_s9), 64 }
 0x13d   : > { %s1356_s26 = sshll.u32 %s2186_s9, 7 }
 0x13e   : > { %p1359_p9 = scmp.eq.s32.totalorder %s1356_s26, 0 }
 0x13f   : > { %s1980_s27 = sshrl.u32 (!%p1359_p9), %s2186_s9, 6 }
 0x140   : > { %857 = sbr.rel (%p1359_p9) target bundleno = 388 (0x184), region = 36  ;;  %p1360_p10 = scmp.le.s32.totalorder (!%p1359_p9), %s1980_s27, 0 }
 0x147   : > { %1263 = sbr.rel (%p1360_p10) target bundleno = 367 (0x16f), region = 112  ;;  %s2177_s12 = smov (!%p1360_p10), %s1974_s25 }
 0x148   : > { %s2178_s17 = smov (!%p1360_p10), %s1837_s21  ;;  %s1989_s20 = smov (!%p1360_p10), 0  }
 0x149   : > { %s1991_s28 = smov (!%p1360_p10), 0  }
 0x14e LB: >> { %v1045_v40 = vld [vmem:[%s1700_s17] sm:$0xff]  ;;  %v1047_v41 = vld [vmem:[%s1700_s17 + $0x8] sm:$0xff]  ;;  %v1049_v42 = vld [vmem:[%s1700_s17 + $0x10] sm:$0xff]  ;;  %s1173_s29 = sadd.s32 1, %s1704_s20  ;;  %s1039_s28 = sadd.s32 1, %s1708_s28   ;;  %s1708_s28 = sphi %s1991_s28, %s1039_s28   ;;  %s1704_s20 = sphi %s1989_s20, %s2181_s20   ;;  %s1700_s17 = sphi %s2178_s17, %s2180_s17   ;;  %s1696_s12 = sphi %s2177_s12, %s2179_s12  }
 0x14f   : >> { %1046 = vst [vmem:[%s1696_s12] sm:$0xff] %v1045_v40  ;;  %1048 = vst [vmem:[%s1696_s12 + $0x8] sm:$0xff] %v1047_v41  ;;  %v1051_v43 = vld [vmem:[%s1700_s17 + $0x18] sm:$0xff]  ;;  %v1053_v44 = vld [vmem:[%s1700_s17 + $0x20] sm:$0xff]  ;;  %p1174_p11 = scmp.ge.s32.totalorder %s1173_s29, %s1980_s27  ;;  %p1038_p12 = scmp.ge.s32.totalorder %s1039_s28, %s1980_s27 }
 0x150   : >> { %1050 = vst [vmem:[%s1696_s12 + $0x10] sm:$0xff] %v1049_v42  ;;  %v1055_v45 = vld [vmem:[%s1700_s17 + $0x28] sm:$0xff]  ;;  %1052 = vst [vmem:[%s1696_s12 + $0x18] sm:$0xff] %v1051_v43  ;;  %v1057_v46 = vld [vmem:[%s1700_s17 + $0x30] sm:$0xff] }
 0x151   : >> { %1054 = vst [vmem:[%s1696_s12 + $0x20] sm:$0xff] %v1053_v44  ;;  %1056 = vst [vmem:[%s1696_s12 + $0x28] sm:$0xff] %v1055_v45  ;;  %v1059_v47 = vld [vmem:[%s1700_s17 + $0x38] sm:$0xff]  ;;  %v1061_v48 = vld [vmem:[%s1700_s17 + $0x40] sm:$0xff]  ;;  %s2188_s29 = smov (%p1174_p11, %s1173_s29), 0 }
 0x152   : >> { %1058 = vst [vmem:[%s1696_s12 + $0x30] sm:$0xff] %v1057_v46  ;;  %1060 = vst [vmem:[%s1696_s12 + $0x38] sm:$0xff] %v1059_v47  ;;  %v1063_v49 = vld [vmem:[%s1700_s17 + $0x48] sm:$0xff]  ;;  %v1065_v50 = vld [vmem:[%s1700_s17 + $0x50] sm:$0xff]  ;;  %s1361_s30 = sshll.u32 %s2188_s29, 9  ;;  %s2181_s20 = smov %s2188_s29 }
 0x153   : >> { %1062 = vst [vmem:[%s1696_s12 + $0x40] sm:$0xff] %v1061_v48  ;;  %v1067_v51 = vld [vmem:[%s1700_s17 + $0x58] sm:$0xff]  ;;  %1064 = vst [vmem:[%s1696_s12 + $0x48] sm:$0xff] %v1063_v49  ;;  %v1069_v52 = vld [vmem:[%s1700_s17 + $0x60] sm:$0xff]  ;;  %s2047_s3 = scalar_lea.vmem %s1837_s21, %s1361_s30 [#allocation2]   ;;  %s2050_s4 = scalar_lea.vmem %s1974_s25, %s1361_s30  }
 0x154   : >> { %1066 = vst [vmem:[%s1696_s12 + $0x50] sm:$0xff] %v1065_v50  ;;  %1068 = vst [vmem:[%s1696_s12 + $0x58] sm:$0xff] %v1067_v51  ;;  %v1071_v53 = vld [vmem:[%s1700_s17 + $0x68] sm:$0xff]  ;;  %v1073_v54 = vld [vmem:[%s1700_s17 + $0x70] sm:$0xff] }
 0x155   : >> { %1070 = vst [vmem:[%s1696_s12 + $0x60] sm:$0xff] %v1069_v52  ;;  %1072 = vst [vmem:[%s1696_s12 + $0x68] sm:$0xff] %v1071_v53  ;;  %v1075_v55 = vld [vmem:[%s1700_s17 + $0x78] sm:$0xff]  ;;  %v1077_v56 = vld [vmem:[%s1700_s17 + $0x80] sm:$0xff] }
 0x156   : >> { %1074 = vst [vmem:[%s1696_s12 + $0x70] sm:$0xff] %v1073_v54  ;;  %v1079_v57 = vld [vmem:[%s1700_s17 + $0x88] sm:$0xff]  ;;  %1076 = vst [vmem:[%s1696_s12 + $0x78] sm:$0xff] %v1075_v55  ;;  %v1081_v58 = vld [vmem:[%s1700_s17 + $0x90] sm:$0xff] }
 0x157   : >> { %1078 = vst [vmem:[%s1696_s12 + $0x80] sm:$0xff] %v1077_v56  ;;  %1080 = vst [vmem:[%s1696_s12 + $0x88] sm:$0xff] %v1079_v57  ;;  %v1083_v59 = vld [vmem:[%s1700_s17 + $0x98] sm:$0xff]  ;;  %v1085_v60 = vld [vmem:[%s1700_s17 + $0xa0] sm:$0xff] }
 0x158   : >> { %1082 = vst [vmem:[%s1696_s12 + $0x90] sm:$0xff] %v1081_v58  ;;  %1084 = vst [vmem:[%s1696_s12 + $0x98] sm:$0xff] %v1083_v59  ;;  %v1087_v61 = vld [vmem:[%s1700_s17 + $0xa8] sm:$0xff]  ;;  %v1089_v62 = vld [vmem:[%s1700_s17 + $0xb0] sm:$0xff] }
 0x159   : >> { %1086 = vst [vmem:[%s1696_s12 + $0xa0] sm:$0xff] %v1085_v60  ;;  %v1091_v63 = vld [vmem:[%s1700_s17 + $0xb8] sm:$0xff]  ;;  %1088 = vst [vmem:[%s1696_s12 + $0xa8] sm:$0xff] %v1087_v61  ;;  %v1093_v0 = vld [vmem:[%s1700_s17 + $0xc0] sm:$0xff] }
 0x15a   : >> { %1090 = vst [vmem:[%s1696_s12 + $0xb0] sm:$0xff] %v1089_v62  ;;  %1092 = vst [vmem:[%s1696_s12 + $0xb8] sm:$0xff] %v1091_v63  ;;  %v1095_v1 = vld [vmem:[%s1700_s17 + $0xc8] sm:$0xff]  ;;  %v1097_v2 = vld [vmem:[%s1700_s17 + $0xd0] sm:$0xff] }
 0x15b   : >> { %1094 = vst [vmem:[%s1696_s12 + $0xc0] sm:$0xff] %v1093_v0  ;;  %1096 = vst [vmem:[%s1696_s12 + $0xc8] sm:$0xff] %v1095_v1  ;;  %v1099_v3 = vld [vmem:[%s1700_s17 + $0xd8] sm:$0xff]  ;;  %v1101_v4 = vld [vmem:[%s1700_s17 + $0xe0] sm:$0xff] }
 0x15c   : >> { %1098 = vst [vmem:[%s1696_s12 + $0xd0] sm:$0xff] %v1097_v2  ;;  %v1103_v5 = vld [vmem:[%s1700_s17 + $0xe8] sm:$0xff]  ;;  %1100 = vst [vmem:[%s1696_s12 + $0xd8] sm:$0xff] %v1099_v3  ;;  %v1105_v6 = vld [vmem:[%s1700_s17 + $0xf0] sm:$0xff] }
 0x15d   : >> { %1102 = vst [vmem:[%s1696_s12 + $0xe0] sm:$0xff] %v1101_v4  ;;  %1104 = vst [vmem:[%s1696_s12 + $0xe8] sm:$0xff] %v1103_v5  ;;  %v1107_v7 = vld [vmem:[%s1700_s17 + $0xf8] sm:$0xff]  ;;  %v1109_v8 = vld [vmem:[%s1700_s17 + $0x100] sm:$0xff] }
 0x15e   : >> { %1106 = vst [vmem:[%s1696_s12 + $0xf0] sm:$0xff] %v1105_v6  ;;  %1108 = vst [vmem:[%s1696_s12 + $0xf8] sm:$0xff] %v1107_v7  ;;  %v1111_v9 = vld [vmem:[%s1700_s17 + $0x108] sm:$0xff]  ;;  %v1113_v10 = vld [vmem:[%s1700_s17 + $0x110] sm:$0xff] }
 0x15f   : >> { %1110 = vst [vmem:[%s1696_s12 + $0x100] sm:$0xff] %v1109_v8  ;;  %v1115_v11 = vld [vmem:[%s1700_s17 + $0x118] sm:$0xff]  ;;  %1112 = vst [vmem:[%s1696_s12 + $0x108] sm:$0xff] %v1111_v9  ;;  %v1117_v12 = vld [vmem:[%s1700_s17 + $0x120] sm:$0xff] }
 0x160   : >> { %1114 = vst [vmem:[%s1696_s12 + $0x110] sm:$0xff] %v1113_v10  ;;  %1116 = vst [vmem:[%s1696_s12 + $0x118] sm:$0xff] %v1115_v11  ;;  %v1119_v13 = vld [vmem:[%s1700_s17 + $0x128] sm:$0xff]  ;;  %v1121_v14 = vld [vmem:[%s1700_s17 + $0x130] sm:$0xff] }
 0x161   : >> { %1118 = vst [vmem:[%s1696_s12 + $0x120] sm:$0xff] %v1117_v12  ;;  %1120 = vst [vmem:[%s1696_s12 + $0x128] sm:$0xff] %v1119_v13  ;;  %v1123_v15 = vld [vmem:[%s1700_s17 + $0x138] sm:$0xff]  ;;  %v1125_v16 = vld [vmem:[%s1700_s17 + $0x140] sm:$0xff] }
 0x162   : >> { %1122 = vst [vmem:[%s1696_s12 + $0x130] sm:$0xff] %v1121_v14  ;;  %v1127_v17 = vld [vmem:[%s1700_s17 + $0x148] sm:$0xff]  ;;  %1124 = vst [vmem:[%s1696_s12 + $0x138] sm:$0xff] %v1123_v15  ;;  %v1129_v18 = vld [vmem:[%s1700_s17 + $0x150] sm:$0xff] }
 0x163   : >> { %1126 = vst [vmem:[%s1696_s12 + $0x140] sm:$0xff] %v1125_v16  ;;  %1128 = vst [vmem:[%s1696_s12 + $0x148] sm:$0xff] %v1127_v17  ;;  %v1131_v19 = vld [vmem:[%s1700_s17 + $0x158] sm:$0xff]  ;;  %v1133_v20 = vld [vmem:[%s1700_s17 + $0x160] sm:$0xff] }
 0x164   : >> { %1130 = vst [vmem:[%s1696_s12 + $0x150] sm:$0xff] %v1129_v18  ;;  %1132 = vst [vmem:[%s1696_s12 + $0x158] sm:$0xff] %v1131_v19  ;;  %v1135_v21 = vld [vmem:[%s1700_s17 + $0x168] sm:$0xff]  ;;  %v1137_v22 = vld [vmem:[%s1700_s17 + $0x170] sm:$0xff] }
 0x165   : >> { %1134 = vst [vmem:[%s1696_s12 + $0x160] sm:$0xff] %v1133_v20  ;;  %v1139_v23 = vld [vmem:[%s1700_s17 + $0x178] sm:$0xff]  ;;  %1136 = vst [vmem:[%s1696_s12 + $0x168] sm:$0xff] %v1135_v21  ;;  %v1141_v24 = vld [vmem:[%s1700_s17 + $0x180] sm:$0xff] }
 0x166   : >> { %1138 = vst [vmem:[%s1696_s12 + $0x170] sm:$0xff] %v1137_v22  ;;  %1140 = vst [vmem:[%s1696_s12 + $0x178] sm:$0xff] %v1139_v23  ;;  %v1143_v25 = vld [vmem:[%s1700_s17 + $0x188] sm:$0xff]  ;;  %v1145_v26 = vld [vmem:[%s1700_s17 + $0x190] sm:$0xff] }
 0x167   : >> { %1142 = vst [vmem:[%s1696_s12 + $0x180] sm:$0xff] %v1141_v24  ;;  %1144 = vst [vmem:[%s1696_s12 + $0x188] sm:$0xff] %v1143_v25  ;;  %v1147_v27 = vld [vmem:[%s1700_s17 + $0x198] sm:$0xff]  ;;  %v1149_v28 = vld [vmem:[%s1700_s17 + $0x1a0] sm:$0xff] }
 0x168   : >> { %1146 = vst [vmem:[%s1696_s12 + $0x190] sm:$0xff] %v1145_v26  ;;  %v1151_v29 = vld [vmem:[%s1700_s17 + $0x1a8] sm:$0xff]  ;;  %1148 = vst [vmem:[%s1696_s12 + $0x198] sm:$0xff] %v1147_v27  ;;  %v1153_v30 = vld [vmem:[%s1700_s17 + $0x1b0] sm:$0xff]  ;;  %1041 = sbr.rel (!%p1038_p12) target bundleno = 334 (0x14e), region = 118 }
 0x169   : >> { %1150 = vst [vmem:[%s1696_s12 + $0x1a0] sm:$0xff] %v1149_v28  ;;  %1152 = vst [vmem:[%s1696_s12 + $0x1a8] sm:$0xff] %v1151_v29  ;;  %v1155_v31 = vld [vmem:[%s1700_s17 + $0x1b8] sm:$0xff]  ;;  %v1157_v32 = vld [vmem:[%s1700_s17 + $0x1c0] sm:$0xff] }
 0x16a   : >> { %1154 = vst [vmem:[%s1696_s12 + $0x1b0] sm:$0xff] %v1153_v30  ;;  %1156 = vst [vmem:[%s1696_s12 + $0x1b8] sm:$0xff] %v1155_v31  ;;  %v1159_v33 = vld [vmem:[%s1700_s17 + $0x1c8] sm:$0xff]  ;;  %v1161_v34 = vld [vmem:[%s1700_s17 + $0x1d0] sm:$0xff] }
 0x16b   : >> { %1158 = vst [vmem:[%s1696_s12 + $0x1c0] sm:$0xff] %v1157_v32  ;;  %v1163_v35 = vld [vmem:[%s1700_s17 + $0x1d8] sm:$0xff]  ;;  %1160 = vst [vmem:[%s1696_s12 + $0x1c8] sm:$0xff] %v1159_v33  ;;  %v1165_v36 = vld [vmem:[%s1700_s17 + $0x1e0] sm:$0xff] }
 0x16c   : >> { %1162 = vst [vmem:[%s1696_s12 + $0x1d0] sm:$0xff] %v1161_v34  ;;  %1164 = vst [vmem:[%s1696_s12 + $0x1d8] sm:$0xff] %v1163_v35  ;;  %v1167_v37 = vld [vmem:[%s1700_s17 + $0x1e8] sm:$0xff]  ;;  %v1169_v38 = vld [vmem:[%s1700_s17 + $0x1f0] sm:$0xff] }
 0x16d   : >> { %1166 = vst [vmem:[%s1696_s12 + $0x1e0] sm:$0xff] %v1165_v36  ;;  %1168 = vst [vmem:[%s1696_s12 + $0x1e8] sm:$0xff] %v1167_v37  ;;  %v1171_v39 = vld [vmem:[%s1700_s17 + $0x1f8] sm:$0xff]  ;;  %s2180_s17 = smov %s2047_s3 }
 0x16e   : >> { %1170 = vst [vmem:[%s1696_s12 + $0x1f0] sm:$0xff] %v1169_v38  ;;  %1172 = vst [vmem:[%s1696_s12 + $0x1f8] sm:$0xff] %v1171_v39  ;;  %s2179_s12 = smov %s2050_s4 }
 0x16f PF: > { %s2155_s5 = sand.u32 63, %s2186_s9   ;;  %s1372_s6 = sshll.u32 %s1980_s27, 9 }
 0x170   : > { %s1184_s7 = scalar_lea.vmem %s1837_s21, %s1372_s6 [#allocation2]   ;;  %s1186_s8 = scalar_lea.vmem %s1974_s25, %s1372_s6  }
 0x171   : > { %p1366_p13 = scmp.le.s32.totalorder %s2155_s5, 0 }
 0x172   : > { %s1710_s11 = smov (!%p1366_p13), %s1186_s8   ;;  %s1714_s14 = smov (!%p1366_p13), %s1184_s7  }
 0x173   : > { %1277 = sbr.rel (%p1366_p13) target bundleno = 388 (0x184), region = 123  ;;  %s1718_s15 = smov (!%p1366_p13), 0  }
 0x174   : > { %s1722_s18 = smov (!%p1366_p13), 0  }
 0x17a LB: >> { %v1196_v40 = vld [vmem:[%s1716_s14] sm:$0xff]  ;;  %s1198_s19 = sadd.s32 1, %s1720_s15  ;;  %s1190_s18 = sadd.s32 1, %s1724_s18   ;;  %s1724_s18 = sphi %s1722_s18, %s1190_s18   ;;  %s1720_s15 = sphi %s1718_s15, %s1719_s15   ;;  %s1716_s14 = sphi %s1714_s14, %s1203_s14   ;;  %s1712_s11 = sphi %s1710_s11, %s1204_s11  }
 0x17b   : >> { %1197 = vst [vmem:[%s1712_s11] sm:$0xff] %v1196_v40  ;;  %p1199_p0 = scmp.ge.s32.totalorder %s1198_s19, %s2155_s5  ;;  %p1189_p1 = scmp.ge.s32.totalorder %s1190_s18, %s2155_s5 }
 0x17d   : >> { %s2190_s19 = smov (%p1199_p0, %s1198_s19), 0  ;;  %1192 = sbr.rel (!%p1189_p1) target bundleno = 378 (0x17a), region = 129 }
 0x17e   : >> { %s1367_s21 = sshll.u32 %s2190_s19, 3  ;;  %s1719_s15 = smov %s2190_s19  }
 0x17f   : >> { %s1203_s14 = scalar_lea.vmem %s1184_s7, %s1367_s21 [#allocation2]   ;;  %s1204_s11 = scalar_lea.vmem %s1186_s8, %s1367_s21  }
 0x184 PF: > { %p9_p2 = scmp.ge.s32.totalorder %s1756_s13, 4   ;;  %s2182_s9 = smov %s1688_s10 }
 0x185   : > { %s2183_s10 = smov %s1764_s16  ;;  %s2184_s11 = smov %s1756_s13 }
 0x186   :  { %11 = sbr.rel (!%p9_p2) target bundleno = 2 (0x2), region = 140 }

// kernel: reverse.1
= control target key start
LH: loop header
LB: loop body
LE: loop exit
PB: predicated region body
PF: predicated region fallthrough
CT: control target
= control target key end

     0   :  { %s344_s0 = inlined_call_operand.vmem [shape: f32[2,16,16,7], index: 0, kind: input, shape index: {}]   ;;  %s345_s1 = inlined_call_operand.vmem [shape: f32[2,16,16,7], index: 1, kind: output, shape index: {}]  }
   0x1   :  { %v112_v0 = vld [vmem:[%s344_s0 + $0x60] sm:$0xff]  ;;  %v113_v1 = vld [vmem:[%s344_s0 + $0xd0] sm:$0xff]  ;;  %v138_v14 = vld [vmem:[%s344_s0 + $0x68] sm:$0xff] }
   0x2   :  { %v115_v2 = vld [vmem:[%s344_s0 + $0x50] sm:$0xff]  ;;  %4 = vst [vmem:[%s345_s1] sm:$0xff] %v112_v0  ;;  %114 = vst [vmem:[%s345_s1 + $0x70] sm:$0xff] %v113_v1  ;;  %v117_v3 = vld [vmem:[%s344_s0 + $0xc0] sm:$0xff] }
   0x3   :  { %116 = vst [vmem:[%s345_s1 + $0x10] sm:$0xff] %v115_v2  ;;  %v119_v4 = vld [vmem:[%s344_s0 + $0x40] sm:$0xff]  ;;  %v121_v5 = vld [vmem:[%s344_s0 + $0xb0] sm:$0xff]  ;;  %118 = vst [vmem:[%s345_s1 + $0x80] sm:$0xff] %v117_v3 }
   0x4   :  { %120 = vst [vmem:[%s345_s1 + $0x20] sm:$0xff] %v119_v4  ;;  %122 = vst [vmem:[%s345_s1 + $0x90] sm:$0xff] %v121_v5  ;;  %v123_v6 = vld [vmem:[%s344_s0 + $0x30] sm:$0xff]  ;;  %v125_v7 = vld [vmem:[%s344_s0 + $0xa0] sm:$0xff] }
   0x5   :  { %v127_v8 = vld [vmem:[%s344_s0 + $0x20] sm:$0xff]  ;;  %124 = vst [vmem:[%s345_s1 + $0x30] sm:$0xff] %v123_v6  ;;  %126 = vst [vmem:[%s345_s1 + $0xa0] sm:$0xff] %v125_v7  ;;  %v129_v9 = vld [vmem:[%s344_s0 + $0x90] sm:$0xff] }
   0x6   :  { %128 = vst [vmem:[%s345_s1 + $0x40] sm:$0xff] %v127_v8  ;;  %v131_v10 = vld [vmem:[%s344_s0 + $0x10] sm:$0xff]  ;;  %v133_v11 = vld [vmem:[%s344_s0 + $0x80] sm:$0xff]  ;;  %130 = vst [vmem:[%s345_s1 + $0xb0] sm:$0xff] %v129_v9 }
   0x7   :  { %132 = vst [vmem:[%s345_s1 + $0x50] sm:$0xff] %v131_v10  ;;  %134 = vst [vmem:[%s345_s1 + $0xc0] sm:$0xff] %v133_v11  ;;  %v49_v12 = vld [vmem:[%s344_s0] sm:$0xff]  ;;  %v136_v13 = vld [vmem:[%s344_s0 + $0x70] sm:$0xff] }
   0x8   :  { %135 = vst [vmem:[%s345_s1 + $0x60] sm:$0xff] %v49_v12  ;;  %137 = vst [vmem:[%s345_s1 + $0xd0] sm:$0xff] %v136_v13  ;;  %v140_v15 = vld [vmem:[%s344_s0 + $0xd8] sm:$0xff]  ;;  %v144_v17 = vld [vmem:[%s344_s0 + $0xc8] sm:$0xff] }
   0x9   :  { %139 = vst [vmem:[%s345_s1 + $0x8] sm:$0xff] %v138_v14  ;;  %v142_v16 = vld [vmem:[%s344_s0 + $0x58] sm:$0xff]  ;;  %141 = vst [vmem:[%s345_s1 + $0x78] sm:$0xff] %v140_v15  ;;  %v146_v18 = vld [vmem:[%s344_s0 + $0x48] sm:$0xff] }
   0xa   :  { %143 = vst [vmem:[%s345_s1 + $0x18] sm:$0xff] %v142_v16  ;;  %145 = vst [vmem:[%s345_s1 + $0x88] sm:$0xff] %v144_v17  ;;  %v148_v19 = vld [vmem:[%s344_s0 + $0xb8] sm:$0xff]  ;;  %v152_v21 = vld [vmem:[%s344_s0 + $0xa8] sm:$0xff] }
   0xb   :  { %v150_v20 = vld [vmem:[%s344_s0 + $0x38] sm:$0xff]  ;;  %147 = vst [vmem:[%s345_s1 + $0x28] sm:$0xff] %v146_v18  ;;  %149 = vst [vmem:[%s345_s1 + $0x98] sm:$0xff] %v148_v19  ;;  %v154_v22 = vld [vmem:[%s344_s0 + $0x28] sm:$0xff] }
   0xc   :  { %151 = vst [vmem:[%s345_s1 + $0x38] sm:$0xff] %v150_v20  ;;  %v156_v23 = vld [vmem:[%s344_s0 + $0x98] sm:$0xff]  ;;  %153 = vst [vmem:[%s345_s1 + $0xa8] sm:$0xff] %v152_v21  ;;  %v160_v25 = vld [vmem:[%s344_s0 + $0x88] sm:$0xff] }
   0xd   :  { %155 = vst [vmem:[%s345_s1 + $0x48] sm:$0xff] %v154_v22  ;;  %157 = vst [vmem:[%s345_s1 + $0xb8] sm:$0xff] %v156_v23  ;;  %v158_v24 = vld [vmem:[%s344_s0 + $0x18] sm:$0xff]  ;;  %v162_v26 = vld [vmem:[%s344_s0 + $0x8] sm:$0xff] }
   0xe   :  { %159 = vst [vmem:[%s345_s1 + $0x58] sm:$0xff] %v158_v24  ;;  %161 = vst [vmem:[%s345_s1 + $0xc8] sm:$0xff] %v160_v25  ;;  %v164_v27 = vld [vmem:[%s344_s0 + $0x78] sm:$0xff] }
   0xf   :  { %163 = vst [vmem:[%s345_s1 + $0x68] sm:$0xff] %v162_v26  ;;  %165 = vst [vmem:[%s345_s1 + $0xd8] sm:$0xff] %v164_v27 }

</bundles_post_ra>
